<compile_context>
chip_gen: v7x
topology: tpu7x:2x2x1
jax: 0.10.0
libtpu: 0.0.40
codegen_flags: <defaults>
</compile_context>

<pallas_src>
import functools
import math

import jax
import jax.numpy as jnp
from jax import lax
from jax.experimental import pallas as pl
from jax.experimental.pallas import tpu as pltpu

EPS = 1e-5              # PyTorch InstanceNorm2d default eps
NEG_SLOPE = 0.2         # LeakyReLU negative slope
LANE = 128
SUBLANE = 8
TARGET_TILE_ROWS = 2048  # flattened (OH*OW) rows per grid step (perf review)


def _round_up(x, m):
    return ((x + m - 1) // m) * m


def _coarse_kernel(x_ref, w_ref, o_ref, sum_ref, ssq_ref, mean_ref, rstd_ref, *,
                   tile_oh, oh_valid, ow_valid, ow_pad, cout, n_valid):
    """One (batch, pass, row-tile) grid step.

    x_ref : (1, OHp+1, OWp+1, 4*Cin) bf16  space-to-depth input, batch-resident
    w_ref : (4, 4*Cin, Cout_pad)     bf16  per-tap folded conv weight, resident
    o_ref : (1, Cout, tile_p)        f32   NCHW-flattened output tile (pass 1)
    sum/ssq/mean/rstd : (1, Cout_pad) f32  per-channel statistics scratch
    """
    s = pl.program_id(1)        # 0 = stats pass, 1 = normalise + write pass
    p = pl.program_id(2)        # output-row tile index
    tile_p = tile_oh * ow_pad
    c4 = x_ref.shape[-1]
    cout_pad = w_ref.shape[-1]

    @pl.when((s == 0) & (p == 0))
    def _():
        sum_ref[...] = jnp.zeros_like(sum_ref)
        ssq_ref[...] = jnp.zeros_like(ssq_ref)

    row0 = pl.multiple_of(p * tile_oh, tile_oh)

    # Mask contributions of padded output rows / cols (only traced when padding
    # exists).  Masked positions contribute exact zeros to the statistics.
    need_mask = (oh_valid % tile_oh != 0) or (ow_pad != ow_valid)
    if need_mask:
        ri = row0 + lax.broadcasted_iota(jnp.int32, (tile_oh, ow_pad, c4), 0)
        ci = lax.broadcasted_iota(jnp.int32, (tile_oh, ow_pad, c4), 1)
        valid = (ri < oh_valid) & (ci < ow_valid)

    # k=4,s=2 conv == 4 accumulating MXU matmuls over the 2x2 stride-1 taps of
    # the space-to-depth input (bf16 operands, f32 accumulation).
    acc = jnp.zeros((tile_p, cout_pad), jnp.float32)
    for tap in range(4):
        dy, dx = tap // 2, tap % 2
        xv = x_ref[0, pl.ds(row0 + dy, tile_oh), pl.ds(dx, ow_pad), :]
        if need_mask:
            xv = jnp.where(valid, xv, jnp.zeros_like(xv))
        xv = xv.reshape(tile_p, c4)           # free: ow_pad % 8 == 0
        acc = acc + jnp.dot(xv, w_ref[tap], preferred_element_type=jnp.float32)

    @pl.when(s == 0)
    def _():
        # Single-pass stats; f32 accumulation is sufficient at the ~2e-2
        # tolerance used for the bf16 matmul path.
        sum_ref[...] += jnp.sum(acc, axis=0, keepdims=True)
        ssq_ref[...] += jnp.sum(acc * acc, axis=0, keepdims=True)

    @pl.when((s == 0) & (p == pl.num_programs(2) - 1))
    def _():
        inv_n = jnp.float32(1.0 / n_valid)
        mean = sum_ref[...] * inv_n
        var = jnp.maximum(ssq_ref[...] * inv_n - mean * mean, 0.0)
        mean_ref[...] = mean
        rstd_ref[...] = lax.rsqrt(var + jnp.float32(EPS))

    @pl.when(s == 1)
    def _():
        y = (acc - mean_ref[...]) * rstd_ref[...]           # (tile_p, Cout_pad)
        # In-kernel transpose -> NCHW-flattened tile; avoids a wrapper-side
        # output read+write pass (XLU slot is idle in this HBM-bound kernel).
        o_ref[0] = jnp.transpose(y)[:cout, :]


def coarse_encode_block(x_nchw, weight, bias=None, *, stride=2, pad=1):
    """Forward pass of CoarseEncodeBlock.

    x_nchw : (B, Cin, H, W)    float32
    weight : (Cout, Cin, 4, 4) float32 (PyTorch Conv2d layout)
    bias   : (Cout,)           float32 (cancelled exactly by InstanceNorm; unused)
    returns: (B, Cout, OH, OW) float32
    """
    del bias  # exact no-op under affine-less InstanceNorm2d (mean subtraction)
    B, Cin, H, W = x_nchw.shape
    Cout, cin_w, KH, KW = weight.shape
    assert cin_w == Cin
    if not (KH == 4 and KW == 4 and stride == 2 and pad == 1):
        # TODO(synk): generalise the space-to-depth decomposition beyond k=4,s=2,p=1.
        raise NotImplementedError("kernel specialised for Conv2d(k=4, s=2, p=1)")

    OH = (H + 2 * pad - KH) // stride + 1
    OW = (W + 2 * pad - KW) // stride + 1
    P = OH * OW
    C4 = 4 * Cin
    Cout_pad = _round_up(Cout, LANE)

    # ---- adaptive output-row tiling ----------------------------------------
    ow_pad = _round_up(OW, SUBLANE)
    m = LANE // math.gcd(ow_pad, LANE)       # tile_oh granularity -> tile_p % 128 == 0
    tile_oh = min(OH, max(1, TARGET_TILE_ROWS // ow_pad))
    if tile_oh < OH:
        n_tiles = pl.cdiv(OH, tile_oh)
        tile_oh = min(OH, _round_up(pl.cdiv(OH, n_tiles), m))
    n_tiles = pl.cdiv(OH, tile_oh)
    oh_pad = n_tiles * tile_oh
    tile_p = tile_oh * ow_pad
    P_pad = oh_pad * ow_pad

    # ---- input: leaky_relu + conv zero-pad + space-to-depth (one fused XLA
    # pass over the SMALL activation tensor; no HBM im2col) -------------------
    x = jnp.transpose(x_nchw, (0, 2, 3, 1))                     # NHWC
    x = jnp.where(x > 0, x, NEG_SLOPE * x)                      # exact f32 leaky_relu
    rows_need = 2 * (oh_pad + 1)
    cols_need = 2 * (ow_pad + 1)
    x = jnp.pad(x, ((0, 0), (pad, rows_need - H - pad),
                    (pad, cols_need - W - pad), (0, 0)))
    x = x.reshape(B, oh_pad + 1, 2, ow_pad + 1, 2, Cin)         # (B, i, py, j, px, C)
    x = jnp.transpose(x, (0, 1, 3, 2, 4, 5))                    # (B, i, j, py, px, C)
    x_s2d = x.reshape(B, oh_pad + 1, ow_pad + 1, C4).astype(jnp.bfloat16)

    # ---- weight: fold to (tap = dy*2+dx, (py,px,cin), cout), pad cout, bf16 -
    w = jnp.transpose(weight, (2, 3, 1, 0))                     # (ky, kx, Cin, Cout)
    w = w.reshape(2, 2, 2, 2, Cin, Cout)                        # (dy, py, dx, px, .)
    w = jnp.transpose(w, (0, 2, 1, 3, 4, 5))                    # (dy, dx, py, px, .)
    w = w.reshape(4, C4, Cout)
    w = jnp.pad(w, ((0, 0), (0, 0), (0, Cout_pad - Cout))).astype(jnp.bfloat16)

    kernel = functools.partial(
        _coarse_kernel, tile_oh=tile_oh, oh_valid=OH, ow_valid=OW,
        ow_pad=ow_pad, cout=Cout, n_valid=P)

    # ---- VMEM accounting (includes double buffers; cap from hardware info) --
    x_block_bytes = (oh_pad + 1) * _round_up(ow_pad + 1, 16) * max(C4, LANE) * 2
    w_bytes = 4 * max(C4, LANE) * Cout_pad * 2
    out_block_bytes = _round_up(Cout, SUBLANE) * tile_p * 4
    acc_bytes = tile_p * Cout_pad * 4
    need = (2 * x_block_bytes + 2 * w_bytes + 2 * out_block_bytes
            + 4 * Cout_pad * 4 + 3 * acc_bytes)
    try:
        vmem_cap = int(pltpu.get_tpu_info().vmem_capacity_bytes)
    except Exception:
        vmem_cap = 64 * 1024 * 1024     # conservative (v7x per-core)
    vmem_limit = int(min(max(2 * need, 32 * 1024 * 1024), int(0.75 * vmem_cap)))
    if need > vmem_limit:
        # TODO(synk): row-tile the (currently batch-resident) space-to-depth
        # input for activations too large to keep one batch element in VMEM.
        raise ValueError("activation too large for the batch-resident input path")

    flops = 2 * 2 * B * P_pad * (4 * C4) * Cout_pad        # matmul run twice (2 passes)
    bytes_accessed = x_s2d.size * 2 + w.size * 2 + B * Cout * P_pad * 4

    # TODO(synk): for B=1 on v7x, additionally shard the row-tile axis across
    # the two TensorCores (partial stats combined via CMEM/SMEM).
    out = pl.pallas_call(
        kernel,
        out_shape=jax.ShapeDtypeStruct((B, Cout, P_pad), jnp.float32),
        grid_spec=pltpu.PrefetchScalarGridSpec(
            num_scalar_prefetch=0,
            grid=(B, 2, n_tiles),
            in_specs=[
                # whole space-to-depth batch element, resident across both passes
                pl.BlockSpec((1, oh_pad + 1, ow_pad + 1, C4),
                             lambda b, s, p: (b, 0, 0, 0)),
                # folded weight, resident across the whole grid
                pl.BlockSpec((4, C4, Cout_pad), lambda b, s, p: (0, 0, 0)),
            ],
            # pass 0 (stats) keeps pointing at block 0 so no unwritten block is
            # ever flushed; pass 1 streams the normalised NCHW tiles.
            out_specs=pl.BlockSpec((1, Cout, tile_p), lambda b, s, p: (b, 0, p * s)),
            scratch_shapes=[pltpu.VMEM((1, Cout_pad), jnp.float32)] * 4,
        ),
        compiler_params=pltpu.CompilerParams(
            dimension_semantics=("parallel", "arbitrary", "arbitrary"),
            vmem_limit_bytes=vmem_limit,
        ),
        cost_estimate=pl.CostEstimate(
            flops=flops,
            transcendentals=B * Cout_pad,
            bytes_accessed=bytes_accessed,
        ),
    )(x_s2d, w)

    out = out.reshape(B, Cout, oh_pad, ow_pad)       # free reshape (minor-dim split)
    if (oh_pad != OH) or (ow_pad != OW):
        out = out[:, :, :OH, :OW]
    return out


def _reference(x_nchw, weight, bias, *, stride=2, pad=1):
    """Pure-JAX f32 reference (leaky_relu -> conv2d(+bias) -> instance norm)."""
    x = jnp.where(x_nchw > 0, x_nchw, NEG_SLOPE * x_nchw)
    y = lax.conv_general_dilated(
        x, weight, window_strides=(stride, stride),
        padding=((pad, pad), (pad, pad)),
        dimension_numbers=("NCHW", "OIHW", "NCHW"),
    ) + bias.reshape(1, -1, 1, 1)
    mean = jnp.mean(y, axis=(2, 3), keepdims=True)
    var = jnp.mean((y - mean) ** 2, axis=(2, 3), keepdims=True)
    return (y - mean) * lax.rsqrt(var + EPS)


if __name__ == "__main__":
    key = jax.random.PRNGKey(0)
    kx, kw, kb = jax.random.split(key, 3)

    B, Cin, H, W = 2, 4, 16, 16
    Cout, K, stride, pad = 64, 4, 2, 1

    x = jax.random.normal(kx, (B, Cin, H, W), dtype=jnp.float32)
    fan_in = Cin * K * K
    weight = jax.random.normal(kw, (Cout, Cin, K, K), dtype=jnp.float32) / jnp.sqrt(fan_in)
    bias = jax.random.normal(kb, (Cout,), dtype=jnp.float32) * 0.01

    fwd = jax.jit(functools.partial(coarse_encode_block, stride=stride, pad=pad))
    out = jax.block_until_ready(fwd(x, weight, bias))

    ref = jax.block_until_ready(_reference(x, weight, bias, stride=stride, pad=pad))
    assert out.shape == (B, Cout, H // 2, W // 2), out.shape
    # bf16 matmul operands with f32 accumulation; instance-norm output is
    # ~unit-std per channel, so a 2e-2 tolerance is appropriate.
    max_err = float(jnp.max(jnp.abs(out - ref)))
    assert jnp.allclose(out, ref, atol=2e-2, rtol=2e-2), max_err

    print("KERNEL_OK")
</pallas_src>

<mosaic_0001>
module attributes {stable_mosaic.version = 11 : i64} {
  func.func @_coarse_kernel(%arg0: i32, %arg1: i32, %arg2: i32, %arg3: memref<1x9x9x16xbf16, #tpu.memory_space<vmem>>, %arg4: memref<4x16x128xbf16, #tpu.memory_space<vmem>>, %arg5: memref<1x64x64xf32, #tpu.memory_space<vmem>>, %arg6: memref<1x128xf32, #tpu.memory_space<vmem>>, %arg7: memref<1x128xf32, #tpu.memory_space<vmem>>, %arg8: memref<1x128xf32, #tpu.memory_space<vmem>>, %arg9: memref<1x128xf32, #tpu.memory_space<vmem>>) attributes {dimension_semantics = [#tpu.dimension_semantics<parallel>, #tpu.dimension_semantics<arbitrary>, #tpu.dimension_semantics<arbitrary>], iteration_bounds = array<i64: 2, 2, 1>, scalar_prefetch = 0 : i64, scratch_operands = 4 : i64, tpu.core_type = #tpu.core_type<tc>, window_params = [{transform_indices = @transform_0, window_bounds = array<i64: 1, 9, 9, 16>}, {pipeline_mode = #tpu.pipeline_mode<synchronous>, transform_indices = @transform_1, window_bounds = array<i64: 4, 16, 128>}, {transform_indices = @transform_2, window_bounds = array<i64: 1, 64, 64>}]} {
    %c0_i32 = arith.constant 0 : i32
    %0 = arith.cmpi eq, %arg1, %c0_i32 : i32
    %c0_i32_0 = arith.constant 0 : i32
    %1 = arith.cmpi eq, %arg2, %c0_i32_0 : i32
    %2 = arith.andi %0, %1 : i1
    %3 = arith.extui %2 : i1 to i32
    %c0_i32_1 = arith.constant 0 : i32
    %4 = arith.cmpi ne, %3, %c0_i32_1 : i32
    scf.if %4 {
      %cst_36 = arith.constant 0.000000e+00 : f32
      %55 = vector.broadcast %cst_36 : f32 to vector<1x128xf32>
      %c0_37 = arith.constant 0 : index
      %c0_38 = arith.constant 0 : index
      %56 = vector.load %arg6[%c0_37, %c0_38] : memref<1x128xf32, #tpu.memory_space<vmem>>, vector<1x128xf32>
      tpu.vector_store %arg6[%c0_37, %c0_38], %55 {strides = array<i32>} : memref<1x128xf32, #tpu.memory_space<vmem>>, vector<1x128xf32>,
      %cst_39 = arith.constant 0.000000e+00 : f32
      %57 = vector.broadcast %cst_39 : f32 to vector<1x128xf32>
      %c0_40 = arith.constant 0 : index
      %c0_41 = arith.constant 0 : index
      %58 = vector.load %arg7[%c0_40, %c0_41] : memref<1x128xf32, #tpu.memory_space<vmem>>, vector<1x128xf32>
      tpu.vector_store %arg7[%c0_40, %c0_41], %57 {strides = array<i32>} : memref<1x128xf32, #tpu.memory_space<vmem>>, vector<1x128xf32>,
    } else {
    }
    %c8_i32 = arith.constant 8 : i32
    %5 = arith.muli %arg2, %c8_i32 : i32
    %6 = tpu.assume_multiple %5, 8 : i32
    %cst = arith.constant 0.000000e+00 : f32
    %7 = vector.broadcast %cst : f32 to vector<64x128xf32>
    %c0_i32_2 = arith.constant 0 : i32
    %8 = arith.addi %6, %c0_i32_2 : i32
    %c0 = arith.constant 0 : index
    %9 = arith.index_cast %8 : i32 to index
    %c0_3 = arith.constant 0 : index
    %c0_4 = arith.constant 0 : index
    %10 = vector.load %arg3[%c0, %9, %c0_3, %c0_4] : memref<1x9x9x16xbf16, #tpu.memory_space<vmem>>, vector<1x8x8x16xbf16>
    %11 = vector.shape_cast %10 : vector<1x8x8x16xbf16> to vector<8x8x16xbf16>
    %12 = vector.shape_cast %11 : vector<8x8x16xbf16> to vector<64x16xbf16>
    %c0_5 = arith.constant 0 : index
    %c0_6 = arith.constant 0 : index
    %c0_7 = arith.constant 0 : index
    %13 = vector.load %arg4[%c0_5, %c0_6, %c0_7] : memref<4x16x128xbf16, #tpu.memory_space<vmem>>, vector<1x16x128xbf16>
    %14 = vector.shape_cast %13 : vector<1x16x128xbf16> to vector<16x128xbf16>
    %cst_8 = arith.constant dense<0.000000e+00> : vector<64x128xf32>
    %15 = tpu.matmul %12, %14, %cst_8 {dimension_numbers = #tpu.dot_dimension_numbers<[1], [0], [0], [1], [0, 0, 1, 1], [], []>} : vector<64x16xbf16>, vector<16x128xbf16>, vector<64x128xf32> -> vector<64x128xf32>
    %16 = arith.addf %7, %15 : vector<64x128xf32>
    %c0_i32_9 = arith.constant 0 : i32
    %17 = arith.addi %6, %c0_i32_9 : i32
    %c0_10 = arith.constant 0 : index
    %18 = arith.index_cast %17 : i32 to index
    %c1 = arith.constant 1 : index
    %c0_11 = arith.constant 0 : index
    %19 = vector.load %arg3[%c0_10, %18, %c1, %c0_11] : memref<1x9x9x16xbf16, #tpu.memory_space<vmem>>, vector<1x8x8x16xbf16>
    %20 = vector.shape_cast %19 : vector<1x8x8x16xbf16> to vector<8x8x16xbf16>
    %21 = vector.shape_cast %20 : vector<8x8x16xbf16> to vector<64x16xbf16>
    %c1_12 = arith.constant 1 : index
    %c0_13 = arith.constant 0 : index
    %c0_14 = arith.constant 0 : index
    %22 = vector.load %arg4[%c1_12, %c0_13, %c0_14] : memref<4x16x128xbf16, #tpu.memory_space<vmem>>, vector<1x16x128xbf16>
    %23 = vector.shape_cast %22 : vector<1x16x128xbf16> to vector<16x128xbf16>
    %cst_15 = arith.constant dense<0.000000e+00> : vector<64x128xf32>
    %24 = tpu.matmul %21, %23, %cst_15 {dimension_numbers = #tpu.dot_dimension_numbers<[1], [0], [0], [1], [0, 0, 1, 1], [], []>} : vector<64x16xbf16>, vector<16x128xbf16>, vector<64x128xf32> -> vector<64x128xf32>
    %25 = arith.addf %16, %24 : vector<64x128xf32>
    %c1_i32 = arith.constant 1 : i32
    %26 = arith.addi %6, %c1_i32 : i32
    %c0_16 = arith.constant 0 : index
    %27 = arith.index_cast %26 : i32 to index
    %c0_17 = arith.constant 0 : index
    %c0_18 = arith.constant 0 : index
    %28 = vector.load %arg3[%c0_16, %27, %c0_17, %c0_18] : memref<1x9x9x16xbf16, #tpu.memory_space<vmem>>, vector<1x8x8x16xbf16>
    %29 = vector.shape_cast %28 : vector<1x8x8x16xbf16> to vector<8x8x16xbf16>
    %30 = vector.shape_cast %29 : vector<8x8x16xbf16> to vector<64x16xbf16>
    %c2 = arith.constant 2 : index
    %c0_19 = arith.constant 0 : index
    %c0_20 = arith.constant 0 : index
    %31 = vector.load %arg4[%c2, %c0_19, %c0_20] : memref<4x16x128xbf16, #tpu.memory_space<vmem>>, vector<1x16x128xbf16>
    %32 = vector.shape_cast %31 : vector<1x16x128xbf16> to vector<16x128xbf16>
    %cst_21 = arith.constant dense<0.000000e+00> : vector<64x128xf32>
    %33 = tpu.matmul %30, %32, %cst_21 {dimension_numbers = #tpu.dot_dimension_numbers<[1], [0], [0], [1], [0, 0, 1, 1], [], []>} : vector<64x16xbf16>, vector<16x128xbf16>, vector<64x128xf32> -> vector<64x128xf32>
    %34 = arith.addf %25, %33 : vector<64x128xf32>
    %c1_i32_22 = arith.constant 1 : i32
    %35 = arith.addi %6, %c1_i32_22 : i32
    %c0_23 = arith.constant 0 : index
    %36 = arith.index_cast %35 : i32 to index
    %c1_24 = arith.constant 1 : index
    %c0_25 = arith.constant 0 : index
    %37 = vector.load %arg3[%c0_23, %36, %c1_24, %c0_25] : memref<1x9x9x16xbf16, #tpu.memory_space<vmem>>, vector<1x8x8x16xbf16>
    %38 = vector.shape_cast %37 : vector<1x8x8x16xbf16> to vector<8x8x16xbf16>
    %39 = vector.shape_cast %38 : vector<8x8x16xbf16> to vector<64x16xbf16>
    %c3 = arith.constant 3 : index
    %c0_26 = arith.constant 0 : index
    %c0_27 = arith.constant 0 : index
    %40 = vector.load %arg4[%c3, %c0_26, %c0_27] : memref<4x16x128xbf16, #tpu.memory_space<vmem>>, vector<1x16x128xbf16>
    %41 = vector.shape_cast %40 : vector<1x16x128xbf16> to vector<16x128xbf16>
    %cst_28 = arith.constant dense<0.000000e+00> : vector<64x128xf32>
    %42 = tpu.matmul %39, %41, %cst_28 {dimension_numbers = #tpu.dot_dimension_numbers<[1], [0], [0], [1], [0, 0, 1, 1], [], []>} : vector<64x16xbf16>, vector<16x128xbf16>, vector<64x128xf32> -> vector<64x128xf32>
    %43 = arith.addf %34, %42 : vector<64x128xf32>
    %c0_i32_29 = arith.constant 0 : i32
    %44 = arith.cmpi eq, %arg1, %c0_i32_29 : i32
    %45 = arith.extui %44 : i1 to i32
    %c0_i32_30 = arith.constant 0 : i32
    %46 = arith.cmpi ne, %45, %c0_i32_30 : i32
    scf.if %46 {
      %c0_36 = arith.constant 0 : index
      %c0_37 = arith.constant 0 : index
      %55 = vector.load %arg6[%c0_36, %c0_37] : memref<1x128xf32, #tpu.memory_space<vmem>>, vector<1x128xf32>
      %cst_38 = arith.constant dense<0.000000e+00> : vector<128xf32>
      %56 = vector.multi_reduction <add>, %43, %cst_38 [0] : vector<64x128xf32> to vector<128xf32>
      %57 = vector.shape_cast %56 : vector<128xf32> to vector<1x128xf32>
      %58 = arith.addf %55, %57 : vector<1x128xf32>
      %c0_39 = arith.constant 0 : index
      %c0_40 = arith.constant 0 : index
      %59 = vector.load %arg6[%c0_39, %c0_40] : memref<1x128xf32, #tpu.memory_space<vmem>>, vector<1x128xf32>
      tpu.vector_store %arg6[%c0_39, %c0_40], %58 {strides = array<i32>} : memref<1x128xf32, #tpu.memory_space<vmem>>, vector<1x128xf32>,
      %c0_41 = arith.constant 0 : index
      %c0_42 = arith.constant 0 : index
      %60 = vector.load %arg7[%c0_41, %c0_42] : memref<1x128xf32, #tpu.memory_space<vmem>>, vector<1x128xf32>
      %61 = arith.mulf %43, %43 : vector<64x128xf32>
      %cst_43 = arith.constant dense<0.000000e+00> : vector<128xf32>
      %62 = vector.multi_reduction <add>, %61, %cst_43 [0] : vector<64x128xf32> to vector<128xf32>
      %63 = vector.shape_cast %62 : vector<128xf32> to vector<1x128xf32>
      %64 = arith.addf %60, %63 : vector<1x128xf32>
      %c0_44 = arith.constant 0 : index
      %c0_45 = arith.constant 0 : index
      %65 = vector.load %arg7[%c0_44, %c0_45] : memref<1x128xf32, #tpu.memory_space<vmem>>, vector<1x128xf32>
      tpu.vector_store %arg7[%c0_44, %c0_45], %64 {strides = array<i32>} : memref<1x128xf32, #tpu.memory_space<vmem>>, vector<1x128xf32>,
    } else {
    }
    %c0_i32_31 = arith.constant 0 : i32
    %47 = arith.cmpi eq, %arg1, %c0_i32_31 : i32
    %c0_i32_32 = arith.constant 0 : i32
    %48 = arith.cmpi eq, %arg2, %c0_i32_32 : i32
    %49 = arith.andi %47, %48 : i1
    %50 = arith.extui %49 : i1 to i32
    %c0_i32_33 = arith.constant 0 : i32
    %51 = arith.cmpi ne, %50, %c0_i32_33 : i32
    scf.if %51 {
      %c0_36 = arith.constant 0 : index
      %c0_37 = arith.constant 0 : index
      %55 = vector.load %arg6[%c0_36, %c0_37] : memref<1x128xf32, #tpu.memory_space<vmem>>, vector<1x128xf32>
      %cst_38 = arith.constant 1.562500e-02 : f32
      %56 = vector.broadcast %cst_38 : f32 to vector<1x128xf32>
      %57 = arith.mulf %55, %56 : vector<1x128xf32>
      %c0_39 = arith.constant 0 : index
      %c0_40 = arith.constant 0 : index
      %58 = vector.load %arg7[%c0_39, %c0_40] : memref<1x128xf32, #tpu.memory_space<vmem>>, vector<1x128xf32>
      %cst_41 = arith.constant 1.562500e-02 : f32
      %59 = vector.broadcast %cst_41 : f32 to vector<1x128xf32>
      %60 = arith.mulf %58, %59 : vector<1x128xf32>
      %61 = arith.mulf %57, %57 : vector<1x128xf32>
      %62 = arith.subf %60, %61 : vector<1x128xf32>
      %cst_42 = arith.constant 0.000000e+00 : f32
      %63 = vector.broadcast %cst_42 : f32 to vector<1x128xf32>
      %64 = arith.maximumf %62, %63 : vector<1x128xf32>
      %c0_43 = arith.constant 0 : index
      %c0_44 = arith.constant 0 : index
      %65 = vector.load %arg8[%c0_43, %c0_44] : memref<1x128xf32, #tpu.memory_space<vmem>>, vector<1x128xf32>
      tpu.vector_store %arg8[%c0_43, %c0_44], %57 {strides = array<i32>} : memref<1x128xf32, #tpu.memory_space<vmem>>, vector<1x128xf32>,
      %cst_45 = arith.constant 9.99999974E-6 : f32
      %66 = vector.broadcast %cst_45 : f32 to vector<1x128xf32>
      %67 = arith.addf %64, %66 : vector<1x128xf32>
      %68 = math.rsqrt %67 : vector<1x128xf32>
      %c0_46 = arith.constant 0 : index
      %c0_47 = arith.constant 0 : index
      %69 = vector.load %arg9[%c0_46, %c0_47] : memref<1x128xf32, #tpu.memory_space<vmem>>, vector<1x128xf32>
      tpu.vector_store %arg9[%c0_46, %c0_47], %68 {strides = array<i32>} : memref<1x128xf32, #tpu.memory_space<vmem>>, vector<1x128xf32>,
    } else {
    }
    %c1_i32_34 = arith.constant 1 : i32
    %52 = arith.cmpi eq, %arg1, %c1_i32_34 : i32
    %53 = arith.extui %52 : i1 to i32
    %c0_i32_35 = arith.constant 0 : i32
    %54 = arith.cmpi ne, %53, %c0_i32_35 : i32
    scf.if %54 {
      %c0_36 = arith.constant 0 : index
      %c0_37 = arith.constant 0 : index
      %55 = vector.load %arg8[%c0_36, %c0_37] : memref<1x128xf32, #tpu.memory_space<vmem>>, vector<1x128xf32>
      %56 = vector.broadcast %55 : vector<1x128xf32> to vector<64x128xf32>
      %57 = arith.subf %43, %56 : vector<64x128xf32>
      %c0_38 = arith.constant 0 : index
      %c0_39 = arith.constant 0 : index
      %58 = vector.load %arg9[%c0_38, %c0_39] : memref<1x128xf32, #tpu.memory_space<vmem>>, vector<1x128xf32>
      %59 = vector.broadcast %58 : vector<1x128xf32> to vector<64x128xf32>
      %60 = arith.mulf %57, %59 : vector<64x128xf32>
      %61 = tpu.transpose %60, [1, 0] : vector<64x128xf32> -> vector<128x64xf32>
      %62 = vector.extract_strided_slice %61 {offsets = [0, 0], sizes = [64, 64], strides = [1, 1]} : vector<128x64xf32> to vector<64x64xf32>
      %c0_40 = arith.constant 0 : index
      %c0_41 = arith.constant 0 : index
      %c0_42 = arith.constant 0 : index
      %63 = vector.load %arg5[%c0_40, %c0_41, %c0_42] : memref<1x64x64xf32, #tpu.memory_space<vmem>>, vector<1x64x64xf32>
      %64 = vector.shape_cast %63 : vector<1x64x64xf32> to vector<64x64xf32>
      %65 = vector.shape_cast %62 : vector<64x64xf32> to vector<1x64x64xf32>
      tpu.vector_store %arg5[%c0_40, %c0_41, %c0_42], %65 {strides = array<i32>} : memref<1x64x64xf32, #tpu.memory_space<vmem>>, vector<1x64x64xf32>,
    } else {
    }
    return
  }
  func.func @transform_0(%arg0: i32, %arg1: i32, %arg2: i32) -> (i32, i32, i32, i32) {
    %c0_i32 = arith.constant 0 : i32
    %c0_i32_0 = arith.constant 0 : i32
    %c0_i32_1 = arith.constant 0 : i32
    %c0_i32_2 = arith.constant 0 : i32
    return %arg0, %c0_i32, %c0_i32_0, %c0_i32_1 : i32, i32, i32, i32
  }
  func.func @transform_1(%arg0: i32, %arg1: i32, %arg2: i32) -> (i32, i32, i32) {
    %c0_i32 = arith.constant 0 : i32
    %c0_i32_0 = arith.constant 0 : i32
    %c0_i32_1 = arith.constant 0 : i32
    %c0_i32_2 = arith.constant 0 : i32
    return %c0_i32, %c0_i32_0, %c0_i32_1 : i32, i32, i32
  }
  func.func @transform_2(%arg0: i32, %arg1: i32, %arg2: i32) -> (i32, i32, i32) {
    %0 = arith.muli %arg2, %arg1 : i32
    %c0_i32 = arith.constant 0 : i32
    %c0_i32_0 = arith.constant 0 : i32
    return %arg0, %c0_i32, %0 : i32, i32, i32
  }
}

</mosaic_0001>

<bundles_post_ra>
// kernel: coarse_encode_block.1
= control target key start
LH: loop header
LB: loop body
LE: loop exit
PB: predicated region body
PF: predicated region fallthrough
CT: control target
= control target key end

     0   :  { %s1388_s9 = smov 0   ;;  %s1390_s10 = smov 0   ;;  %s1668_s0 = inlined_call_operand.vmem [shape: bf16[2,9,9,16], index: 0, kind: input, shape index: {}]   ;;  %s1669_s1 = inlined_call_operand.vmem [shape: bf16[4,16,128], index: 1, kind: input, shape index: {}]   ;;  %s1670_s2 = inlined_call_operand.vmem [shape: f32[2,64,64], index: 2, kind: output, shape index: {}]  }
   0x1   :  { %s1392_s11 = smov 0   ;;  %s1394_s12 = smov 0  }
   0x2   :  { %s1396_s13 = smov 0  }
   0x3 LB: > { %s27_s14 = sadd.s32 1, %s1362_s11  ;;  %s31_s15 = sadd.s32 1, %s1366_s12  ;;  %s1370_s13 = sphi %s1396_s13, %s12_s13   ;;  %s1366_s12 = sphi %s1394_s12, %s1676_s12   ;;  %s1362_s11 = sphi %s1392_s11, %s1675_s11   ;;  %s1358_s10 = sphi %s1390_s10, %s1674_s10   ;;  %s1354_s9 = sphi %s1388_s9, %s1673_s9  }
   0x4   : > { %p29_p0 = scmp.ge.s32.totalorder %s27_s14, 2  ;;  %p1112_p1 = scmp.ge.s32.totalorder %s1370_s13, 1 }
   0x5   : > { %p135_p2 = scmp.lt.s32.totalorder %s1370_s13, 5 }
   0x6   : > { %s1678_s14 = smov (%p29_p0, %s27_s14), 0  ;;  %s1680_s15 = smov (!%p29_p0, %s31_s15), %s1366_s12 }
   0x7   : > { %p136_p3 = pnand %p1112_p1, %p135_p2  ;;  %p33_p4 = scmp.ge.s32.totalorder %s1680_s15, 2 }
   0x8   : > { %p161_p5 = scmp.lt.s32.totalorder (!%p136_p3), %s1358_s10, 1  ;;  %p177_p6 = scmp.eq.s32.totalorder (!%p136_p3), %s1354_s9, 0 }
   0x9   : > { %s1682_s15 = smov (%p33_p4, %s1680_s15), 0  ;;  %139 = sbr.rel (%p136_p3) target bundleno = 508 (0x1fc), region = 28 }
  0x10   : > { %s1684_s10 = smov (!%p161_p5, %s1358_s10), 1  ;;  %182 = sbr.rel (!%p177_p6) target bundleno = 23 (0x17), region = 32 }
  0x11   : > { %s1275_s16 = smul.u32 72, %s1684_s10  ;;  %s1189_s17 = sshll.u32 %s1684_s10, 6  ;;  %v1372_v0 = vmov (%p177_p6), 0.0  }
  0x12   : > { %s1424_s20 = scalar_lea.vmem %s1670_s2, %s1189_s17  ;;  %183 = vst [vmem:[#allocation2] sm:$0x1] (%p177_p6), %v1372_v0  ;;  %184 = vst [vmem:[#allocation3] sm:$0x1] (%p177_p6), %v1372_v0 }
  0x13   : > { %s1429_s23 = scalar_lea.vmem %s1668_s0, %s1275_s16 }
  0x17 PF: > { %v1318_v1 = vld [vmem:[%s1669_s1 + $0x10] sm:$0xff]   ;;  %vm343_vm0 = vcmask 130048   ;;  %v1320_v3 = vld [vmem:[%s1429_s23 + $0x18] ss:$8 sps:$4 sm:$0xff]   ;;  %v1321_v4 = vld [vmem:[%s1669_s1 + $0x8] sm:$0xff]   ;;  %p1183_p7 = scmp.ne.s32.totalorder %s1354_s9, 0 }
  0x18   : > { %v1319_v2 = vld [vmem:[%s1429_s23 + $0x8] ss:$8 sps:$4 sm:$0xff]   ;;  %1231 = vmatprep.subr.bf16.mxu0 %v1318_v1  ;;  %v1443_v5 = vld [vmem:[%s1429_s23] sm:$0xf]  ;;  %v199_v7 = vld [vmem:[%s1429_s23 + $0x4] sm:$0x1]  ;;  %1211 = vmatprep.subr.bf16.mxu1 %v1321_v4 }
  0x19   : > { %1232 = vmatpush3.bf16.msra.mxu0 %v1318_v1  ;;  %1233 = vmatprep.mubr.msk.bf16.mxu0 %vm343_vm0, %v1319_v2  ;;  %v1446_v6 = vld [vmem:[%s1429_s23 + $0x8] sm:$0xf]  ;;  %v200_v8 = vld [vmem:[%s1429_s23 + $0xc] sm:$0x1]  ;;  %vm207_vm1 = vsmask.f32 3328 }
  0x1a   : > { %vm208_vm2 = vsmask.f32 7440  ;;  %1212 = vmatpush3.bf16.msra.mxu1 %v1321_v4  ;;  %v211_v9 = vshrl.u32 %v1443_v5, 16  ;;  %v214_v10 = vshll.u32 %v1443_v5, 16  ;;  %v220_v11 = vshll.u32 %v199_v7, 16  ;;  %v1458_v15 = vld [vmem:[%s1669_s1] sm:$0xff]  }
  0x1b   : > { %v225_v12 = vshrl.u32 %v1446_v6, 16  ;;  %v228_v13 = vshll.u32 %v1446_v6, 16  ;;  %v234_v14 = vshll.u32 %v200_v8, 16  ;;  %v1323_v16 = vld [vmem:[%s1669_s1 + $0x18] sm:$0xff]   ;;  %1221 = vmatprep.subr.bf16.mxu1 %v1458_v15  ;;  %v1465_v23 = vld [vmem:[%s1429_s23 + $0x10] sm:$0xf]  ;;  %vm1474_vm3 = vmor %vm207_vm1, %vm208_vm2  ;;  %v1128_v55 = vcombine.low %v1443_v5, %v1446_v6 }
  0x1c   : > { %1234 = vmatmul.mubr.msk.bf16.vlgmr.msra.gmra.mrb[0].mxu0 %vm343_vm0, %v1320_v3  ;;  %v213_v17 = vrot.slane %v211_v9, 4  ;;  %v216_v18 = vrot.slane %v214_v10, 5  ;;  %v222_v19 = vrot.slane %v220_v11, 5  ;;  %1241 = vmatprep.subr.bf16.mxu0 %v1323_v16  ;;  %v1468_v25 = vld [vmem:[%s1429_s23 + $0x18] sm:$0xf]  ;;  %v239_v30 = vshrl.u32 %v1465_v23, 16 }
  0x1d   : > { %v227_v20 = vrot.slane %v225_v12, 4  ;;  %v230_v21 = vrot.slane %v228_v13, 5  ;;  %v236_v22 = vrot.slane %v234_v14, 5  ;;  %v201_v26 = vld [vmem:[%s1429_s23 + $0x14] sm:$0x1]  ;;  %1242 = vmatpush3.bf16.msra.mxu0 %v1323_v16  ;;  %v242_v31 = vshll.u32 %v1465_v23, 16 }
  0x1e   : > { %v217_v24 = vor.u32 %v216_v18, %v213_v17  ;;  %v202_v27 = vld [vmem:[%s1429_s23 + $0x1c] sm:$0x1]  ;;  %v248_v32 = vshll.u32 %v201_v26, 16  ;;  %v253_v34 = vshrl.u32 %v1468_v25, 16  ;;  %v256_v35 = vshll.u32 %v1468_v25, 16 }
  0x1f   : > { %v231_v29 = vor.u32 %v230_v21, %v227_v20  ;;  %v262_v36 = vshll.u32 %v202_v27, 16  ;;  %v241_v38 = vrot.slane %v239_v30, 4  ;;  %v244_v39 = vrot.slane %v242_v31, 5  ;;  %v1324_v41 = vld [vmem:[%s1429_s23 + $0x28] ss:$8 sps:$4 sm:$0xff]  }
  0x20   : > { %v218_v33 = vrot.slane %v217_v24, 4  ;;  %v250_v40 = vrot.slane %v248_v32, 5  ;;  %v255_v43 = vrot.slane %v253_v34, 4  ;;  %v258_v44 = vrot.slane %v256_v35, 5  ;;  %1237 = vmatprep.mubr.msk.bf16.mxu0 %vm343_vm0, %v1324_v41  ;;  %v1325_v48 = vld [vmem:[%s1429_s23 + $0x38] ss:$8 sps:$4 sm:$0xff]  }
  0x21   : > { %v232_v37 = vrot.slane %v231_v29, 4  ;;  %v264_v45 = vrot.slane %v262_v36, 5  ;;  %v245_v47 = vor.u32 %v244_v39, %v241_v38  ;;  %v1490_v49 = vld [vmem:[%s1429_s23 + $0x20] sm:$0xf]  ;;  %v1493_v52 = vld [vmem:[%s1429_s23 + $0x28] sm:$0xf]  ;;  %v1129_v56 = vcombine.low %v1465_v23, %v1468_v25 }
  0x22   : > { %v223_v42 = vsel %vm1474_vm3, %v218_v33, %v222_v19  ;;  %v259_v51 = vor.u32 %v258_v44, %v255_v43  ;;  %v203_v53 = vld [vmem:[%s1429_s23 + $0x24] sm:$0x1]  ;;  %v204_v54 = vld [vmem:[%s1429_s23 + $0x2c] sm:$0x1]  ;;  %v267_v58 = vshrl.u32 %v1490_v49, 16  ;;  %v270_v59 = vshll.u32 %v1490_v49, 16 }
  0x23   : > { %v237_v46 = vsel %vm1474_vm3, %v232_v37, %v236_v22  ;;  %v246_v57 = vrot.slane %v245_v47, 4  ;;  %v276_v60 = vshll.u32 %v203_v53, 16  ;;  %v1505_v61 = vld [vmem:[%s1429_s23 + $0x30] sm:$0xf]  ;;  %v281_v63 = vshrl.u32 %v1493_v52, 16 }
  0x24   : > { %v1119_v50 = vcombine.low %v223_v42, %v237_v46  ;;  %1238 = vmatmul.mubr.msk.bf16.gmra.mrb[4].mxu0 %vm343_vm0, %v1325_v48  ;;  %v260_v62 = vrot.slane %v259_v51, 4  ;;  %v284_v0 = vshll.u32 %v1493_v52, 16  ;;  %v290_v1 = vshll.u32 %v204_v54, 16  ;;  %v1511_v2 = vld [vmem:[%s1429_s23 + $0x38] sm:$0xf] }
  0x25   : > { %v251_v3 = vsel %vm1474_vm3, %v246_v57, %v250_v40  ;;  %v269_v4 = vrot.slane %v267_v58, 4  ;;  %v272_v7 = vrot.slane %v270_v59, 5  ;;  %v278_v8 = vrot.slane %v276_v60, 5  ;;  %v205_v9 = vld [vmem:[%s1429_s23 + $0x34] sm:$0x1] }
  0x26   : > { %1213 = vmatprep.mubr.msk.bf16.mxu1 %vm343_vm0, %v1119_v50  ;;  %v265_v10 = vsel %vm1474_vm3, %v260_v62, %v264_v45  ;;  %v283_v11 = vrot.slane %v281_v63, 4  ;;  %v286_v12 = vrot.slane %v284_v0, 5  ;;  %v292_v13 = vrot.slane %v290_v1, 5  ;;  %v206_v14 = vld [vmem:[%s1429_s23 + $0x3c] sm:$0x1] }
  0x27   : > { %v1120_v16 = vcombine.low %v251_v3, %v265_v10  ;;  %v273_v17 = vor.u32 %v272_v7, %v269_v4  ;;  %v295_v18 = vshrl.u32 %v1505_v61, 16  ;;  %v298_v19 = vshll.u32 %v1505_v61, 16  ;;  %v1156_v26 = vld [vmem:[%s1429_s23 + $0x8] sm:$0xf]  ;;  %v1157_v32 = vld [vmem:[%s1429_s23 + $0xc] sm:$0x1] }
  0x28   : > { %v287_v20 = vor.u32 %v286_v12, %v283_v11  ;;  %v304_v21 = vshll.u32 %v205_v9, 16  ;;  %v309_v22 = vshrl.u32 %v1511_v2, 16  ;;  %v312_v24 = vshll.u32 %v1511_v2, 16  ;;  %v1158_v37 = vld [vmem:[%s1429_s23 + $0x10] sm:$0xf] }
  0x29   : > { %1214 = vmatmul.mubr.msk.bf16.vlgmr.msra.gmra.mrb[0].mxu1 %vm343_vm0, %v1120_v16  ;;  %v274_v27 = vrot.slane %v273_v17, 4  ;;  %v297_v29 = vrot.slane %v295_v18, 4  ;;  %v300_v30 = vrot.slane %v298_v19, 5  ;;  %v318_v31 = vshll.u32 %v206_v14, 16  ;;  %v1159_v44 = vld [vmem:[%s1429_s23 + $0x14] sm:$0x1] }
  0x2a   : > { %1222 = vmatpush3.bf16.msra.mxu1 %v1458_v15  ;;  %v288_v33 = vrot.slane %v287_v20, 4  ;;  %v306_v34 = vrot.slane %v304_v21, 5  ;;  %v311_v35 = vrot.slane %v309_v22, 4  ;;  %v314_v36 = vrot.slane %v312_v24, 5  ;;  %v1160_v46 = vld [vmem:[%s1429_s23 + $0x18] sm:$0xf] }
  0x2b   : > { %v279_v38 = vsel %vm1474_vm3, %v274_v27, %v278_v8  ;;  %v301_v39 = vor.u32 %v300_v30, %v297_v29  ;;  %v320_v40 = vrot.slane %v318_v31, 5  ;;  %v667_v41 = vshrl.u32 %v1156_v26, 16  ;;  %v1161_v59 = vld [vmem:[%s1429_s23 + $0x1c] sm:$0x1]  ;;  %v1162_v0 = vld [vmem:[%s1429_s23 + $0x20] sm:$0xf] }
  0x2c   : > { %v293_v42 = vsel %vm1474_vm3, %v288_v33, %v292_v13  ;;  %v315_v43 = vor.u32 %v314_v36, %v311_v35  ;;  %v670_v45 = vshll.u32 %v1156_v26, 16  ;;  %v676_v15 = vshll.u32 %v1157_v32, 16  ;;  %v1163_v8 = vld [vmem:[%s1429_s23 + $0x24] sm:$0x1]  ;;  %v1164_v10 = vld [vmem:[%s1429_s23 + $0x28] sm:$0xf] }
  0x2d   : > { %v1121_v47 = vcombine.low %v279_v38, %v293_v42  ;;  %v302_v48 = vrot.slane %v301_v39, 4  ;;  %v669_v50 = vrot.slane %v667_v41, 4  ;;  %v681_v51 = vshrl.u32 %v1158_v37, 16  ;;  %v1165_v20 = vld [vmem:[%s1429_s23 + $0x2c] sm:$0x1] }
  0x2e   : > { %v316_v53 = vrot.slane %v315_v43, 4  ;;  %v672_v54 = vrot.slane %v670_v45, 5  ;;  %v678_v57 = vrot.slane %v676_v15, 5  ;;  %v684_v58 = vshll.u32 %v1158_v37, 16  ;;  %v1166_v26 = vld [vmem:[%s1429_s23 + $0x30] sm:$0xf] }
  0x2f   : > { %1217 = vmatprep.mubr.msk.bf16.mxu1 %vm343_vm0, %v1121_v47  ;;  %v307_v60 = vsel %vm1474_vm3, %v302_v48, %v306_v34  ;;  %v683_v62 = vrot.slane %v681_v51, 4  ;;  %v690_v63 = vshll.u32 %v1159_v44, 16  ;;  %v695_v1 = vshrl.u32 %v1160_v46, 16  ;;  %v1167_v35 = vld [vmem:[%s1429_s23 + $0x34] sm:$0x1] }
  0x30   : > { %v321_v3 = vsel %vm1474_vm3, %v316_v53, %v320_v40  ;;  %v673_v4 = vor.u32 %v672_v54, %v669_v50  ;;  %v686_v7 = vrot.slane %v684_v58, 5  ;;  %v698_v9 = vshll.u32 %v1160_v46, 16  ;;  %v1168_v42 = vld [vmem:[%s1429_s23 + $0x38] sm:$0xf]  ;;  %v1169_v45 = vld [vmem:[%s1429_s23 + $0x3c] sm:$0x1] }
  0x31   : > { %v1122_v11 = vcombine.low %v307_v60, %v321_v3  ;;  %v692_v12 = vrot.slane %v690_v63, 5  ;;  %v697_v13 = vrot.slane %v695_v1, 4  ;;  %v704_v14 = vshll.u32 %v1161_v59, 16  ;;  %v1171_v58 = vld [vmem:[%s1429_s23 + $0x44] sm:$0x1] }
  0x32   : > { %v674_v16 = vrot.slane %v673_v4, 4  ;;  %v687_v17 = vor.u32 %v686_v7, %v683_v62  ;;  %v700_v18 = vrot.slane %v698_v9, 5  ;;  %v709_v19 = vshrl.u32 %v1162_v0, 16 }
  0x33   : > { %1218 = vmatmul.mubr.msk.bf16.gmra.mrb[4].mxu1 %vm343_vm0, %v1122_v11  ;;  %v706_v21 = vrot.slane %v704_v14, 5  ;;  %v712_v22 = vshll.u32 %v1162_v0, 16  ;;  %v718_v24 = vshll.u32 %v1163_v8, 16  ;;  %v723_v27 = vshrl.u32 %v1164_v10, 16 }
  0x34   : > { %v679_v29 = vsel %vm1474_vm3, %v674_v16, %v678_v57  ;;  %v688_v30 = vrot.slane %v687_v17, 4  ;;  %v701_v31 = vor.u32 %v700_v18, %v697_v13  ;;  %v711_v32 = vrot.slane %v709_v19, 4  ;;  %1223 = vmatprep.mubr.msk.bf16.mxu1 %vm343_vm0, %v1128_v55  ;;  %v1170_v55 = vld [vmem:[%s1429_s23 + $0x40] sm:$0xf] }
  0x35   : > { %v714_v33 = vrot.slane %v712_v22, 5  ;;  %v720_v34 = vrot.slane %v718_v24, 5  ;;  %v725_v36 = vrot.slane %v723_v27, 4  ;;  %v726_v37 = vshll.u32 %v1164_v10, 16 }
  0x36   : > { %v693_v38 = vsel %vm1474_vm3, %v688_v30, %v692_v12  ;;  %v702_v39 = vrot.slane %v701_v31, 4  ;;  %v732_v40 = vshll.u32 %v1165_v20, 16  ;;  %v737_v41 = vshrl.u32 %v1166_v26, 16 }
  0x37   : > { %v1174_v43 = vcombine.low %v679_v29, %v693_v38  ;;  %v715_v44 = vor.u32 %v714_v33, %v711_v32  ;;  %v728_v5 = vrot.slane %v726_v37, 5  ;;  %v740_v6 = vshll.u32 %v1166_v26, 16 }
  0x38   : > { %v707_v15 = vsel %vm1474_vm3, %v702_v39, %v706_v21  ;;  %v734_v46 = vrot.slane %v732_v40, 5  ;;  %v739_v47 = vrot.slane %v737_v41, 4  ;;  %v746_v48 = vshll.u32 %v1167_v35, 16 }
  0x39   : > { %1243 = vmatprep.mubr.msk.bf16.mxu0 %vm343_vm0, %v1174_v43  ;;  %v716_v50 = vrot.slane %v715_v44, 4  ;;  %v729_v51 = vor.u32 %v728_v5, %v725_v36  ;;  %v742_v53 = vrot.slane %v740_v6, 5  ;;  %v751_v54 = vshrl.u32 %v1168_v42, 16 }
  0x3a   : > { %v748_v57 = vrot.slane %v746_v48, 5  ;;  %v754_v59 = vshll.u32 %v1168_v42, 16  ;;  %v760_v60 = vshll.u32 %v1169_v45, 16  ;;  %v765_v62 = vshrl.u32 %v1170_v55, 16 }
  0x3b   : > { %v721_v63 = vsel %vm1474_vm3, %v716_v50, %v720_v34  ;;  %1224 = vmatmul.mubr.msk.bf16.vlgmr.msra.gmra.mrb[0].mxu1 %vm343_vm0, %v1129_v56  ;;  %v730_v0 = vrot.slane %v729_v51, 4  ;;  %v743_v1 = vor.u32 %v742_v53, %v739_v47  ;;  %v753_v3 = vrot.slane %v751_v54, 4 }
  0x3c   : > { %v1175_v4 = vcombine.low %v707_v15, %v721_v63  ;;  %v756_v7 = vrot.slane %v754_v59, 5  ;;  %v767_v8 = vrot.slane %v765_v62, 4  ;;  %v768_v11 = vshll.u32 %v1170_v55, 16 }
  0x3d   : > { %v735_v9 = vsel %vm1474_vm3, %v730_v0, %v734_v46  ;;  %v744_v10 = vrot.slane %v743_v1, 4  ;;  %v774_v12 = vshll.u32 %v1171_v58, 16  ;;  %v1130_v23 = vcombine.low %v1490_v49, %v1493_v52 }
  0x3e   : > { %1244 = vmatmul.mubr.msk.bf16.vlgmr.msra.gmra.mrb[0].mxu0 %vm343_vm0, %v1175_v4  ;;  %v757_v13 = vor.u32 %v756_v7, %v753_v3  ;;  %v762_v56 = vrot.slane %v760_v60, 5  ;;  %v770_v14 = vrot.slane %v768_v11, 5  ;;  %v1131_v16 = vcombine.low %v1505_v61, %v1511_v2 }
  0x3f   : > { %v749_v25 = vsel %vm1474_vm3, %v744_v10, %v748_v57  ;;  %1227 = vmatprep.mubr.msk.bf16.mxu1 %vm343_vm0, %v1130_v23  ;;  %v776_v20 = vrot.slane %v774_v12, 5 }
  0x40   : > { %v1176_v17 = vcombine.low %v735_v9, %v749_v25  ;;  %v758_v18 = vrot.slane %v757_v13, 4  ;;  %v771_v19 = vor.u32 %v770_v14, %v767_v8 }
  0x42   : > { %1247 = vmatprep.mubr.msk.bf16.mxu0 %vm343_vm0, %v1176_v17  ;;  %v763_v21 = vsel %vm1474_vm3, %v758_v18, %v762_v56  ;;  %v772_v49 = vrot.slane %v771_v19, 4  ;;  %v903_v19 = vld [vmem:[#allocation3] sm:$0x1] (!%p1183_p7) }
  0x43   : > { %1228 = vmatmul.mubr.msk.bf16.gmra.mrb[4].mxu1 %vm343_vm0, %v1131_v16  ;;  %v887_v16 = vld [vmem:[#allocation2] sm:$0x1] (!%p1183_p7) }
  0x44   : > { %v777_v52 = vsel %vm1474_vm3, %v772_v49, %v776_v20 }
  0x45   : > { %v1177_v22 = vcombine.low %v763_v21, %v777_v52 }
  0x47   : > { %1248 = vmatmul.mubr.msk.bf16.gmra.mrb[4].mxu0 %vm343_vm0, %v1177_v22 }
 0x10e   : > { %v1225_v61 = vpop.f32.mrb[0].mxu1 }
 0x10f   : > { %v493_v2 = vpop.f32.mrb[1].mxu1 }
 0x110   : > { %v1226_v24 = vpop.f32.mrb[2].mxu1 }
 0x111   : > { %v1245_v26 = vpop.f32.mrb[0].mxu0  ;;  %v496_v27 = vpop.f32.mrb[3].mxu1 }
 0x112   : > { %v845_v29 = vpop.f32.mrb[1].mxu0  ;;  %v1585_v30 = vadd.f32 %v1245_v26, %v1225_v61 }
 0x113   : > { %v1246_v31 = vpop.f32.mrb[2].mxu0  ;;  %v1587_v32 = vadd.f32 %v845_v29, %v493_v2 }
 0x114   : > { %v848_v33 = vpop.f32.mrb[3].mxu0  ;;  %v1589_v34 = vadd.f32 %v1246_v31, %v1226_v24  ;;  %v906_v46 = vmul.f32 (!%p1183_p7), %v1585_v30, %v1585_v30 }
 0x115   : > { %v1591_v35 = vadd.f32 %v848_v33, %v496_v27  ;;  %v904_v55 = vmul.f32 (!%p1183_p7), %v1587_v32, %v1587_v32 }
 0x116   : > { %v1229_v28 = vpop.f32.mrb[4].mxu1  ;;  %v907_v48 = vmul.f32 (!%p1183_p7), %v1589_v34, %v1589_v34 }
 0x117   : > { %v509_v36 = vpop.f32.mrb[5].mxu1  ;;  %v888_v45 = vadd.f32 (!%p1183_p7), %v1591_v35, %v1587_v32  ;;  %v905_v15 = vmul.f32 (!%p1183_p7), %v1591_v35, %v1591_v35 }
 0x118   : > { %v1230_v37 = vpop.f32.mrb[6].mxu1  ;;  %886 = sbr.rel (%p1183_p7) target bundleno = 311 (0x137), region = 36 }
 0x119   : > { %v512_v38 = vpop.f32.mrb[7].mxu1  ;;  %v889_v47 = vadd.f32 (!%p1183_p7), %v1585_v30, %v888_v45  ;;  %v912_v50 = vadd.f32 (!%p1183_p7), %v905_v15, %v904_v55 }
 0x11a   : > { %v1249_v39 = vpop.f32.mrb[4].mxu0 }
 0x11b   : > { %v861_v40 = vpop.f32.mrb[5].mxu0  ;;  %v1593_v41 = vadd.f32 %v1249_v39, %v1229_v28  ;;  %v890_v51 = vadd.f32 (!%p1183_p7), %v1589_v34, %v889_v47  ;;  %v913_v54 = vadd.f32 (!%p1183_p7), %v912_v50, %v906_v46 }
 0x11c   : > { %v1250_v42 = vpop.f32.mrb[6].mxu0  ;;  %v1595_v43 = vadd.f32 %v861_v40, %v509_v36 }
 0x11d   : > { %v864_v44 = vpop.f32.mrb[7].mxu0  ;;  %v1597_v5 = vadd.f32 %v1250_v42, %v1230_v37  ;;  %v914_v59 = vadd.f32 (!%p1183_p7), %v913_v54, %v907_v48  ;;  %v910_v62 = vmul.f32 (!%p1183_p7), %v1593_v41, %v1593_v41 }
 0x11e   : > { %v1599_v6 = vadd.f32 %v864_v44, %v512_v38  ;;  %v908_v53 = vmul.f32 (!%p1183_p7), %v1595_v43, %v1595_v43  ;;  %v891_v57 = vadd.f32 (!%p1183_p7), %v1595_v43, %v890_v51 }
 0x11f   : > { %v911_v1 = vmul.f32 %v1597_v5, %v1597_v5 }
 0x120   : > { %v909_v58 = vmul.f32 %v1599_v6, %v1599_v6  ;;  %v892_v60 = vadd.f32 %v1599_v6, %v891_v57  ;;  %v915_v63 = vadd.f32 %v914_v59, %v908_v53 }
 0x122   : > { %v893_v0 = vadd.f32 %v1593_v41, %v892_v60  ;;  %v916_v3 = vadd.f32 %v915_v63, %v909_v58 }
 0x124   : > { %v894_v4 = vadd.f32 %v1597_v5, %v893_v0  ;;  %v917_v7 = vadd.f32 %v916_v3, %v910_v62 }
 0x126   : > { %v895_v8 = vrot.slane %v894_v4, 4  ;;  %v918_v9 = vadd.f32 %v917_v7, %v911_v1 }
 0x128   : > { %v896_v10 = vadd.f32 %v895_v8, %v894_v4  ;;  %v919_v11 = vrot.slane %v918_v9, 4 }
 0x12a   : > { %v897_v12 = vrot.slane %v896_v10, 2  ;;  %v920_v13 = vadd.f32 %v919_v11, %v918_v9 }
 0x12c   : > { %v898_v23 = vadd.f32 %v897_v12, %v896_v10  ;;  %v921_v25 = vrot.slane %v920_v13, 2 }
 0x12e   : > { %v899_v56 = vrot.slane %v898_v23, 1  ;;  %v922_v14 = vadd.f32 %v921_v25, %v920_v13 }
 0x130   : > { %v900_v17 = vadd.f32 %v899_v56, %v898_v23  ;;  %v923_v18 = vrot.slane %v922_v14, 1 }
 0x132   : > { %v901_v20 = vadd.f32 %v900_v17, %v887_v16  ;;  %v924_v21 = vadd.f32 %v923_v18, %v922_v14 }
 0x134   : > { %902 = vst [vmem:[#allocation2] sm:$0x1] %v901_v20  ;;  %v925_v49 = vadd.f32 %v924_v21, %v903_v19 }
 0x136   : > { %926 = vst [vmem:[#allocation3] sm:$0x1] %v925_v49 }
 0x137 PF: > { %928 = sbr.rel (!%p177_p6) target bundleno = 338 (0x152), region = 40 }
 0x13b   : > { %v929_v52 = vld [vmem:[#allocation2] sm:$0x1] (%p177_p6) }
 0x13c   : > { %v930_v61 = vmul.f32 (%p177_p6), 0.015625, %v929_v52 }
 0x13d   : > { %v931_v22 = vld [vmem:[#allocation3] sm:$0x1] (%p177_p6) }
 0x13e   : > { %v932_v2 = vmul.f32 0.015625, %v931_v22  ;;  %v933_v24 = vmul.f32 %v930_v61, %v930_v61  ;;  %936 = vst [vmem:[#allocation4] sm:$0x1] %v930_v61 }
 0x140   : > { %v934_v26 = vsub.f32 %v932_v2, %v933_v24 }
 0x142   : > { %v935_v27 = vmax.f32 %v934_v26, 0.0 }
 0x144   : > { %v937_v29 = vadd.f32 1e-05, %v935_v27 }
 0x146   : > { %1330 = vrsqrt.f32 %v937_v29 }
 0x150   : > { %v1331_v31 = vpop.eup %1330 }
 0x151   : > { %939 = vst [vmem:[#allocation5] sm:$0x1] %v1331_v31 }
 0x152 PF: > { %p1184_p8 = scmp.ne.s32.totalorder %s1354_s9, 1 }
 0x153   : > { %vm1006_vm4 = vcmask (!%p1184_p8), 523264  }
 0x154   : > { %943 = sbr.rel (%p1184_p8) target bundleno = 508 (0x1fc), region = 44 }
 0x158   : > { %v1186_v28 = vld [vmem:[#allocation5] ss:$0 sm:$0xff] (!%p1184_p8) }
 0x159   : > { %v1185_v33 = vld [vmem:[#allocation4] ss:$0 sm:$0xff] (!%p1184_p8) }
 0x15a   : > { %v951_v36 = vsub.f32 (!%p1184_p8), %v1587_v32, %v1185_v33  ;;  %v952_v37 = vsub.f32 (!%p1184_p8), %v1591_v35, %v1185_v33  ;;  %v953_v40 = vsub.f32 (!%p1184_p8), %v1585_v30, %v1185_v33  ;;  %v954_v44 = vsub.f32 (!%p1184_p8), %v1589_v34, %v1185_v33 }
 0x15b   : > { %v955_v55 = vsub.f32 %v1595_v43, %v1185_v33  ;;  %v956_v32 = vsub.f32 %v1599_v6, %v1185_v33  ;;  %v957_v30 = vsub.f32 %v1593_v41, %v1185_v33  ;;  %v958_v34 = vsub.f32 %v1597_v5, %v1185_v33 }
 0x15c   : > { %v966_v38 = vmul.f32 %v1186_v28, %v951_v36  ;;  %v967_v39 = vmul.f32 %v1186_v28, %v952_v37  ;;  %v968_v42 = vmul.f32 %v1186_v28, %v953_v40  ;;  %v969_v45 = vmul.f32 %v1186_v28, %v954_v44 }
 0x15d   : > { %v970_v15 = vmul.f32 %v1186_v28, %v955_v55  ;;  %v971_v35 = vmul.f32 %v1186_v28, %v956_v32  ;;  %v972_v46 = vmul.f32 %v1186_v28, %v957_v30  ;;  %v973_v47 = vmul.f32 %v1186_v28, %v958_v34 }
 0x15e   : > { %974 = vxpose.xlu0.b32.start [1/8] (short) (narrow) %v966_v38, 64 }
 0x162   : > { %975 = vxpose.xlu0.b32.cont [2/8] (short) (narrow) %v967_v39, 64 }
 0x166   : > { %976 = vxpose.xlu0.b32.cont [3/8] (short) (narrow) %v968_v42, 64 }
 0x16a   : > { %977 = vxpose.xlu0.b32.cont [4/8] (short) (narrow) %v969_v45, 64 }
 0x16e   : > { %978 = vxpose.xlu0.b32.cont [5/8] (short) (narrow) %v970_v15, 64 }
 0x172   : > { %979 = vxpose.xlu0.b32.cont [6/8] (short) (narrow) %v971_v35, 64 }
 0x176   : > { %980 = vxpose.xlu0.b32.cont [7/8] (short) (narrow) %v972_v46, 64 }
 0x17a   : > { %981 = vxpose.xlu0.b32.end [8/8] (short) (narrow) %v973_v47, 64 }
 0x1de   : > { %v990_v43 = vpop.trf.xlu0 }
 0x1df   : > { %1007 = vst.msk [vmem:[%s1424_s20] sm:$0xff] %vm1006_vm4, %v990_v43 }
 0x1e2   : > { %v991_v6 = vpop.trf.xlu0 }
 0x1e3   : > { %1008 = vst.msk [vmem:[%s1424_s20 + $0x8] sm:$0xff] %vm1006_vm4, %v991_v6 }
 0x1e6   : > { %v992_v48 = vpop.trf.xlu0 }
 0x1e7   : > { %1009 = vst.msk [vmem:[%s1424_s20 + $0x10] sm:$0xff] %vm1006_vm4, %v992_v48 }
 0x1ea   : > { %v993_v41 = vpop.trf.xlu0 }
 0x1eb   : > { %1010 = vst.msk [vmem:[%s1424_s20 + $0x18] sm:$0xff] %vm1006_vm4, %v993_v41 }
 0x1ee   : > { %v994_v5 = vpop.trf.xlu0 }
 0x1ef   : > { %1011 = vst.msk [vmem:[%s1424_s20 + $0x20] sm:$0xff] %vm1006_vm4, %v994_v5 }
 0x1f2   : > { %v995_v50 = vpop.trf.xlu0 }
 0x1f3   : > { %1012 = vst.msk [vmem:[%s1424_s20 + $0x28] sm:$0xff] %vm1006_vm4, %v995_v50 }
 0x1f6   : > { %v996_v51 = vpop.trf.xlu0 }
 0x1f7   : > { %1013 = vst.msk [vmem:[%s1424_s20 + $0x30] sm:$0xff] %vm1006_vm4, %v996_v51 }
 0x1fa   : > { %v997_v53 = vpop.trf.xlu0 }
 0x1fb   : > { %1014 = vst.msk [vmem:[%s1424_s20 + $0x38] sm:$0xff] %vm1006_vm4, %v997_v53 }
 0x1fc PF: > { %s12_s13 = sadd.s32 1, %s1370_s13   ;;  %s1673_s9 = smov %s1362_s11 }
 0x1fd   : > { %p9_p9 = scmp.ge.s32.totalorder %s12_s13, 6   ;;  %s1674_s10 = smov %s1366_s12 }
 0x1fe   : > { %s1675_s11 = smov %s1678_s14  ;;  %s1676_s12 = smov %s1682_s15 }
 0x1ff   :  { %11 = sbr.rel (!%p9_p9) target bundleno = 3 (0x3), region = 79 }

</bundles_post_ra>
